<compile_context>
chip_gen: v7x
topology: tpu7x:2x2x1
jax: 0.10.0
libtpu: 0.0.40
codegen_flags: <defaults>
</compile_context>

<pallas_src>
import jax
import jax.numpy as jnp
from jax.experimental import pallas as pl
from jax.experimental.pallas import tpu as pltpu


def _round_up(x, m):
    return ((x + m - 1) // m) * m


def _two_layer_nn_kernel(x_ref, w1_ref, b1_ref, w2_ref, b2_ref, w3_ref, b3_ref, o_ref):
    # Fused MLP hot path: 3 MXU matmuls (f32 accumulation) + 2 VPU ReLUs, all in vregs.
    x = x_ref[...]
    cdt = x.dtype  # MXU operand dtype (bf16 by default, f32 optional)

    h1 = jnp.dot(x, w1_ref[...], preferred_element_type=jnp.float32) + b1_ref[...]
    h1 = jnp.maximum(h1, 0.0).astype(cdt)

    h2 = jnp.dot(h1, w2_ref[...], preferred_element_type=jnp.float32) + b2_ref[...]
    h2 = jnp.maximum(h2, 0.0).astype(cdt)

    y = jnp.dot(h2, w3_ref[...], preferred_element_type=jnp.float32) + b3_ref[...]
    o_ref[...] = y.astype(o_ref.dtype)


def two_layer_nn_forward(x, params, *, compute_dtype=jnp.bfloat16, block_batch=512):
    """Fused 3-layer MLP forward.

    x: (B, input_size) float32.
    params: dict with w1 (in,h), b1 (1,h), w2 (h,h), b2 (1,h), w3 (h,out), b3 (1,out).
    """
    w1, b1 = params["w1"], params["b1"]
    w2, b2 = params["w2"], params["b2"]
    w3, b3 = params["w3"], params["b3"]

    B, in_size = x.shape
    hidden = w1.shape[1]
    out_size = w3.shape[1]

    # MXU operands in compute_dtype; biases stay f32 for the f32 bias-add path.
    xc = x.astype(compute_dtype)
    w1c, w2c, w3c = (w.astype(compute_dtype) for w in (w1, w2, w3))
    b1c, b2c, b3c = (b.astype(jnp.float32) for b in (b1, b2, b3))

    # Batch tile: sublane-aligned, large enough to amortize per-step overhead, small
    # enough that double-buffered (x, out) tiles stay far inside the scoped VMEM default
    # even on v7x (64 MiB physical / 32 MiB scoped).
    tb = min(block_batch, _round_up(B, 8))
    b_pad = _round_up(B, tb)
    if b_pad != B:
        xc = jnp.pad(xc, ((0, b_pad - B), (0, 0)))
    grid = (b_pad // tb,)

    def resident(a):  # full array, same block every step -> stays VMEM-resident
        return pl.BlockSpec(a.shape, lambda i: (0, 0))

    itemsize = jnp.dtype(compute_dtype).itemsize
    flops = 2 * b_pad * (in_size * hidden + hidden * hidden + hidden * out_size)
    bytes_accessed = (
        b_pad * in_size * itemsize                                     # x stream
        + (in_size * hidden + hidden * hidden + hidden * out_size) * itemsize  # weights
        + (2 * hidden + out_size) * 4                                  # biases (f32)
        + b_pad * out_size * 4                                         # output (f32)
    )

    out = pl.pallas_call(
        _two_layer_nn_kernel,
        out_shape=jax.ShapeDtypeStruct((b_pad, out_size), jnp.float32),
        grid=grid,
        in_specs=[
            pl.BlockSpec((tb, in_size), lambda i: (i, 0)),
            resident(w1c), resident(b1c),
            resident(w2c), resident(b2c),
            resident(w3c), resident(b3c),
        ],
        out_specs=pl.BlockSpec((tb, out_size), lambda i: (i, 0)),
        compiler_params=pltpu.CompilerParams(dimension_semantics=("parallel",)),
        cost_estimate=pl.CostEstimate(
            flops=flops, transcendentals=0, bytes_accessed=bytes_accessed),
    )(xc, w1c, b1c, w2c, b2c, w3c, b3c)

    return out[:B]


def init_params(key, input_size, hidden_size, output_size):
    """Deterministic init matching nn.Linear shapes (weights stored transposed)."""
    ks = jax.random.split(key, 6)

    def lin(kw, kb, fan_in, fan_out):
        bound = 1.0 / jnp.sqrt(fan_in)
        w = jax.random.uniform(kw, (fan_in, fan_out), jnp.float32, -bound, bound)
        b = jax.random.uniform(kb, (1, fan_out), jnp.float32, -bound, bound)
        return w, b

    w1, b1 = lin(ks[0], ks[1], input_size, hidden_size)
    w2, b2 = lin(ks[2], ks[3], hidden_size, hidden_size)
    w3, b3 = lin(ks[4], ks[5], hidden_size, output_size)
    return {"w1": w1, "b1": b1, "w2": w2, "b2": b2, "w3": w3, "b3": b3}


def _reference(x, p):
    h1 = jnp.maximum(x @ p["w1"] + p["b1"], 0.0)
    h2 = jnp.maximum(h1 @ p["w2"] + p["b2"], 0.0)
    return h2 @ p["w3"] + p["b3"]


if __name__ == "__main__":
    input_size, hidden_size, output_size = 16, 32, 4

    key = jax.random.PRNGKey(0)
    kx, kp = jax.random.split(key)
    params = init_params(kp, input_size, hidden_size, output_size)

    # jit the caller so repeated invocations amortize launch overhead.
    fwd = jax.jit(two_layer_nn_forward, static_argnames=("compute_dtype", "block_batch"))

    # Case 1: sublane-aligned batch, f32 MXU operands (tight tolerance vs reference).
    x64 = jax.random.normal(kx, (64, input_size), jnp.float32)
    out_f32 = jax.block_until_ready(fwd(x64, params, compute_dtype=jnp.float32))
    ref64 = _reference(x64, params)
    assert out_f32.shape == (64, output_size)
    assert jnp.allclose(out_f32, ref64, atol=1e-5, rtol=1e-5), "f32 mismatch vs reference"

    # Case 2: default bf16 MXU operands with f32 accumulation (looser tolerance).
    out_bf16 = jax.block_until_ready(fwd(x64, params))
    assert jnp.allclose(out_bf16, ref64, atol=5e-2, rtol=5e-2), "bf16 mismatch vs reference"

    # Case 3: ragged batch (exercises padding up to the batch tile).
    x10 = jax.random.normal(kx, (10, input_size), jnp.float32)
    out10 = jax.block_until_ready(fwd(x10, params))
    ref10 = _reference(x10, params)
    assert out10.shape == (10, output_size)
    assert jnp.allclose(out10, ref10, atol=5e-2, rtol=5e-2), "ragged-batch mismatch vs reference"

    print("KERNEL_OK")
</pallas_src>

<mosaic_0001>
module attributes {stable_mosaic.version = 11 : i64} {
  func.func @_two_layer_nn_kernel(%arg0: i32, %arg1: memref<64x16xf32, #tpu.memory_space<vmem>>, %arg2: memref<16x32xf32, #tpu.memory_space<vmem>>, %arg3: memref<1x32xf32, #tpu.memory_space<vmem>>, %arg4: memref<32x32xf32, #tpu.memory_space<vmem>>, %arg5: memref<1x32xf32, #tpu.memory_space<vmem>>, %arg6: memref<32x4xf32, #tpu.memory_space<vmem>>, %arg7: memref<1x4xf32, #tpu.memory_space<vmem>>, %arg8: memref<64x4xf32, #tpu.memory_space<vmem>>) attributes {dimension_semantics = [#tpu.dimension_semantics<parallel>], iteration_bounds = array<i64: 1>, scalar_prefetch = 0 : i64, scratch_operands = 0 : i64, tpu.core_type = #tpu.core_type<tc>, window_params = [{transform_indices = @transform_0, window_bounds = array<i64: 64, 16>}, {pipeline_mode = #tpu.pipeline_mode<synchronous>, transform_indices = @transform_1, window_bounds = array<i64: 16, 32>}, {pipeline_mode = #tpu.pipeline_mode<synchronous>, transform_indices = @transform_2, window_bounds = array<i64: 1, 32>}, {pipeline_mode = #tpu.pipeline_mode<synchronous>, transform_indices = @transform_3, window_bounds = array<i64: 32, 32>}, {pipeline_mode = #tpu.pipeline_mode<synchronous>, transform_indices = @transform_4, window_bounds = array<i64: 1, 32>}, {pipeline_mode = #tpu.pipeline_mode<synchronous>, transform_indices = @transform_5, window_bounds = array<i64: 32, 4>}, {pipeline_mode = #tpu.pipeline_mode<synchronous>, transform_indices = @transform_6, window_bounds = array<i64: 1, 4>}, {transform_indices = @transform_7, window_bounds = array<i64: 64, 4>}]} {
    %c0 = arith.constant 0 : index
    %c0_0 = arith.constant 0 : index
    %0 = vector.load %arg1[%c0, %c0_0] : memref<64x16xf32, #tpu.memory_space<vmem>>, vector<64x16xf32>
    %c0_1 = arith.constant 0 : index
    %c0_2 = arith.constant 0 : index
    %1 = vector.load %arg2[%c0_1, %c0_2] : memref<16x32xf32, #tpu.memory_space<vmem>>, vector<16x32xf32>
    %cst = arith.constant dense<0.000000e+00> : vector<64x32xf32>
    %2 = tpu.matmul %0, %1, %cst {dimension_numbers = #tpu.dot_dimension_numbers<[1], [0], [0], [1], [0, 0, 1, 1], [], []>} : vector<64x16xf32>, vector<16x32xf32>, vector<64x32xf32> -> vector<64x32xf32>
    %c0_3 = arith.constant 0 : index
    %c0_4 = arith.constant 0 : index
    %3 = vector.load %arg3[%c0_3, %c0_4] : memref<1x32xf32, #tpu.memory_space<vmem>>, vector<1x32xf32>
    %4 = vector.broadcast %3 : vector<1x32xf32> to vector<64x32xf32>
    %5 = arith.addf %2, %4 : vector<64x32xf32>
    %cst_5 = arith.constant 0.000000e+00 : f32
    %6 = vector.broadcast %cst_5 : f32 to vector<64x32xf32>
    %7 = arith.maximumf %5, %6 : vector<64x32xf32>
    %c0_6 = arith.constant 0 : index
    %c0_7 = arith.constant 0 : index
    %8 = vector.load %arg4[%c0_6, %c0_7] : memref<32x32xf32, #tpu.memory_space<vmem>>, vector<32x32xf32>
    %cst_8 = arith.constant dense<0.000000e+00> : vector<64x32xf32>
    %9 = tpu.matmul %7, %8, %cst_8 {dimension_numbers = #tpu.dot_dimension_numbers<[1], [0], [0], [1], [0, 0, 1, 1], [], []>} : vector<64x32xf32>, vector<32x32xf32>, vector<64x32xf32> -> vector<64x32xf32>
    %c0_9 = arith.constant 0 : index
    %c0_10 = arith.constant 0 : index
    %10 = vector.load %arg5[%c0_9, %c0_10] : memref<1x32xf32, #tpu.memory_space<vmem>>, vector<1x32xf32>
    %11 = vector.broadcast %10 : vector<1x32xf32> to vector<64x32xf32>
    %12 = arith.addf %9, %11 : vector<64x32xf32>
    %cst_11 = arith.constant 0.000000e+00 : f32
    %13 = vector.broadcast %cst_11 : f32 to vector<64x32xf32>
    %14 = arith.maximumf %12, %13 : vector<64x32xf32>
    %c0_12 = arith.constant 0 : index
    %c0_13 = arith.constant 0 : index
    %15 = vector.load %arg6[%c0_12, %c0_13] : memref<32x4xf32, #tpu.memory_space<vmem>>, vector<32x4xf32>
    %cst_14 = arith.constant dense<0.000000e+00> : vector<64x4xf32>
    %16 = tpu.matmul %14, %15, %cst_14 {dimension_numbers = #tpu.dot_dimension_numbers<[1], [0], [0], [1], [0, 0, 1, 1], [], []>} : vector<64x32xf32>, vector<32x4xf32>, vector<64x4xf32> -> vector<64x4xf32>
    %c0_15 = arith.constant 0 : index
    %c0_16 = arith.constant 0 : index
    %17 = vector.load %arg7[%c0_15, %c0_16] : memref<1x4xf32, #tpu.memory_space<vmem>>, vector<1x4xf32>
    %18 = vector.broadcast %17 : vector<1x4xf32> to vector<64x4xf32>
    %19 = arith.addf %16, %18 : vector<64x4xf32>
    %c0_17 = arith.constant 0 : index
    %c0_18 = arith.constant 0 : index
    %20 = vector.load %arg8[%c0_17, %c0_18] : memref<64x4xf32, #tpu.memory_space<vmem>>, vector<64x4xf32>
    tpu.vector_store %arg8[%c0_17, %c0_18], %19 {strides = array<i32>} : memref<64x4xf32, #tpu.memory_space<vmem>>, vector<64x4xf32>,
    return
  }
  func.func @transform_0(%arg0: i32) -> (i32, i32) {
    %c0_i32 = arith.constant 0 : i32
    %c0_i32_0 = arith.constant 0 : i32
    return %arg0, %c0_i32 : i32, i32
  }
  func.func @transform_1(%arg0: i32) -> (i32, i32) {
    %c0_i32 = arith.constant 0 : i32
    %c0_i32_0 = arith.constant 0 : i32
    %c0_i32_1 = arith.constant 0 : i32
    return %c0_i32, %c0_i32_0 : i32, i32
  }
  func.func @transform_2(%arg0: i32) -> (i32, i32) {
    %c0_i32 = arith.constant 0 : i32
    %c0_i32_0 = arith.constant 0 : i32
    %c0_i32_1 = arith.constant 0 : i32
    return %c0_i32, %c0_i32_0 : i32, i32
  }
  func.func @transform_3(%arg0: i32) -> (i32, i32) {
    %c0_i32 = arith.constant 0 : i32
    %c0_i32_0 = arith.constant 0 : i32
    %c0_i32_1 = arith.constant 0 : i32
    return %c0_i32, %c0_i32_0 : i32, i32
  }
  func.func @transform_4(%arg0: i32) -> (i32, i32) {
    %c0_i32 = arith.constant 0 : i32
    %c0_i32_0 = arith.constant 0 : i32
    %c0_i32_1 = arith.constant 0 : i32
    return %c0_i32, %c0_i32_0 : i32, i32
  }
  func.func @transform_5(%arg0: i32) -> (i32, i32) {
    %c0_i32 = arith.constant 0 : i32
    %c0_i32_0 = arith.constant 0 : i32
    %c0_i32_1 = arith.constant 0 : i32
    return %c0_i32, %c0_i32_0 : i32, i32
  }
  func.func @transform_6(%arg0: i32) -> (i32, i32) {
    %c0_i32 = arith.constant 0 : i32
    %c0_i32_0 = arith.constant 0 : i32
    %c0_i32_1 = arith.constant 0 : i32
    return %c0_i32, %c0_i32_0 : i32, i32
  }
  func.func @transform_7(%arg0: i32) -> (i32, i32) {
    %c0_i32 = arith.constant 0 : i32
    %c0_i32_0 = arith.constant 0 : i32
    return %arg0, %c0_i32 : i32, i32
  }
}

</mosaic_0001>

<bundles_post_ra>
// kernel: two_layer_nn_forward.1
= control target key start
LH: loop header
LB: loop body
LE: loop exit
PB: predicated region body
PF: predicated region fallthrough
CT: control target
= control target key end

     0   :  { %vm43_vm0 = vcmask 130048   ;;  %vm192_vm1 = vcmask 261120   ;;  %vm470_vm2 = vcmask 31744   ;;  %s781_s1 = inlined_call_operand.vmem [shape: f32[16,32], index: 1, kind: input, shape index: {}]   ;;  %s782_s0 = inlined_call_operand.vmem [shape: f32[64,16], index: 0, kind: input, shape index: {}]   ;;  %s783_s3 = inlined_call_operand.vmem [shape: f32[32,32], index: 3, kind: input, shape index: {}]   ;;  %s784_s5 = inlined_call_operand.vmem [shape: f32[32,4], index: 5, kind: input, shape index: {}]   ;;  %s785_s2 = inlined_call_operand.vmem [shape: f32[1,32], index: 2, kind: input, shape index: {}]   ;;  %s786_s4 = inlined_call_operand.vmem [shape: f32[1,32], index: 4, kind: input, shape index: {}]   ;;  %s787_s6 = inlined_call_operand.vmem [shape: f32[1,4], index: 6, kind: input, shape index: {}]   ;;  %s788_s7 = inlined_call_operand.vmem [shape: f32[64,4], index: 7, kind: output, shape index: {}]  }
   0x1   :  { %v34_v0 = vld [vmem:[%s781_s1] sm:$0xff]  ;;  %v35_v1 = vld [vmem:[%s781_s1 + $0x8] sm:$0xff]  ;;  %v28_v10 = vld [vmem:[%s782_s0 + $0x10] sm:$0xff] }
   0x2   :  { %v26_v2 = vld [vmem:[%s782_s0] sm:$0xff]  ;;  %v600_v3 = vpack.c.bf16 %v35_v1, %v34_v0  ;;  %v182_v6 = vld [vmem:[%s783_s3 + $0x8] sm:$0xff]  ;;  %v32_v11 = vld [vmem:[%s782_s0 + $0x30] sm:$0xff] }
   0x3   :  { %548 = vmatprep.mubr.msk.f32.mxu0 %vm43_vm0, %v26_v2  ;;  %v30_v4 = vld [vmem:[%s782_s0 + $0x20] sm:$0xff]  ;;  %v27_v7 = vld [vmem:[%s782_s0 + $0x8] sm:$0xff]  ;;  %v29_v12 = vld [vmem:[%s782_s0 + $0x18] sm:$0xff] }
   0x4   :  { %601 = vmatprep.subr.bf16.mxu0 %v600_v3  ;;  %620 = vmatprep.subr.bf16.mxu1 %v600_v3  ;;  %v181_v5 = vld [vmem:[%s783_s3] sm:$0xff]  ;;  %v31_v8 = vld [vmem:[%s782_s0 + $0x28] sm:$0xff]  ;;  %v33_v13 = vld [vmem:[%s782_s0 + $0x38] sm:$0xff] }
   0x5   :  { %603 = vmatpush3.bf16.msra.mxu0 %v600_v3  ;;  %621 = vmatpush3.bf16.msra.mxu1 %v600_v3  ;;  %v604_v9 = vpack.c.bf16 %v182_v6, %v181_v5  ;;  %v183_v14 = vld [vmem:[%s783_s3 + $0x10] sm:$0xff]  ;;  %v184_v15 = vld [vmem:[%s783_s3 + $0x18] sm:$0xff]  ;;  %v330_v17 = vld [vmem:[%s784_s5] sm:$0xff] }
   0x6   :  { %554 = vmatprep.mubr.msk.f32.mxu1 %vm43_vm0, %v30_v4  ;;  %v608_v16 = vpack.c.bf16 %v184_v15, %v183_v14  ;;  %v331_v18 = vld [vmem:[%s784_s5 + $0x8] sm:$0xff]  ;;  %v483_v20 = vld [vmem:[%s785_s2] ss:$0 sm:$0xff]  ;;  %v332_v45 = vld [vmem:[%s784_s5 + $0x10] sm:$0xff] }
   0x7   :  { %605 = vmatprep.subr.bf16.mxu1 %v604_v9  ;;  %v612_v19 = vpack.c.bf16 %v331_v18, %v330_v17  ;;  %v333_v46 = vld [vmem:[%s784_s5 + $0x18] sm:$0xff]  ;;  %v492_v48 = vld [vmem:[%s786_s4] ss:$0 sm:$0xff] }
   0x8   :  { %549 = vmatmul.mubr.msk.f32.vlgmr.msra.gmra.mrb[0].mxu0 %vm43_vm0, %v27_v7  ;;  %555 = vmatmul.mubr.msk.f32.vlgmr.msra.gmra.mrb[0].mxu1 %vm43_vm0, %v31_v8  ;;  %v616_v47 = vpack.c.bf16 %v333_v46, %v332_v45 }
   0x9   :  { %551 = vmatprep.mubr.msk.f32.mxu0 %vm43_vm0, %v28_v10  ;;  %557 = vmatprep.mubr.msk.f32.mxu1 %vm43_vm0, %v32_v11 }
   0xa   :  { %607 = vmatpush3.bf16.msra.mxu1 %v604_v9  ;;  %613 = vmatprep.subr.bf16.mxu0 %v612_v19  ;;  %v501_v9 = vld [vmem:[%s787_s6] ss:$0 sm:$0xff] }
   0xb   :  { %609 = vmatprep.subr.bf16.mxu1 %v608_v16  ;;  %615 = vmatpush3.bf16.msra.mxu0 %v612_v19 }
   0xc   :  { %552 = vmatmul.mubr.msk.f32.gmra.mrb[2].mxu0 %vm43_vm0, %v29_v12  ;;  %558 = vmatmul.mubr.msk.f32.gmra.mrb[2].mxu1 %vm43_vm0, %v33_v13 }
   0xd   :  { %617 = vmatprep.subr.bf16.mxu0 %v616_v47 }
   0xe   :  { %611 = vmatpush3.bf16.msra.mxu1 %v608_v16 }
   0xf   :  { %619 = vmatpush3.bf16.msra.mxu0 %v616_v47 }
  0xdb   :  { %v550_v21 = vpop.f32.mrb[0].mxu0  ;;  %v556_v22 = vpop.f32.mrb[0].mxu1 }
  0xdc   :  { %v140_v23 = vadd.f32 %v550_v21, %v483_v20  ;;  %v134_v24 = vpop.f32.mrb[1].mxu0  ;;  %v154_v25 = vpop.f32.mrb[1].mxu1  ;;  %v160_v40 = vadd.f32 %v556_v22, %v483_v20 }
  0xdd   :  { %v135_v26 = vadd.f32 %v483_v20, %v134_v24  ;;  %v155_v29 = vadd.f32 %v483_v20, %v154_v25 }
  0xde   :  { %v174_v31 = vmax.f32 %v140_v23, 0.0  ;;  %v178_v42 = vmax.f32 %v160_v40, 0.0 }
  0xdf   :  { %v173_v27 = vmax.f32 %v135_v26, 0.0  ;;  %v553_v28 = vpop.f32.mrb[2].mxu0  ;;  %v559_v30 = vpop.f32.mrb[2].mxu1  ;;  %v177_v37 = vmax.f32 %v155_v29, 0.0 }
  0xe0   :  { %v150_v32 = vadd.f32 %v553_v28, %v483_v20  ;;  %v144_v33 = vpop.f32.mrb[3].mxu0  ;;  %v164_v34 = vpop.f32.mrb[3].mxu1  ;;  %v170_v43 = vadd.f32 %v559_v30, %v483_v20 }
  0xe1   :  { %v145_v35 = vadd.f32 %v483_v20, %v144_v33  ;;  %568 = vmatprep.mubr.msk.f32.mxu1 %vm192_vm1, %v173_v27  ;;  %v165_v38 = vadd.f32 %v483_v20, %v164_v34 }
  0xe2   :  { %569 = vmatmul.mubr.msk.f32.vlgmr.msra.gmra.mrb[4].mxu1 %vm192_vm1, %v174_v31  ;;  %v176_v39 = vmax.f32 %v150_v32, 0.0  ;;  %v180_v44 = vmax.f32 %v170_v43, 0.0 }
  0xe3   :  { %v175_v36 = vmax.f32 %v145_v35, 0.0  ;;  %v179_v41 = vmax.f32 %v165_v38, 0.0 }
  0xe5   :  { %571 = vmatprep.mubr.msk.f32.mxu1 %vm192_vm1, %v175_v36 }
  0xe6   :  { %572 = vmatmul.mubr.msk.f32.gmra.mrb[6].mxu1 %vm192_vm1, %v176_v39 }
  0xe7   :  { %574 = vmatprep.mubr.msk.f32.mxu1 %vm192_vm1, %v177_v37 }
  0xea   :  { %575 = vmatmul.mubr.msk.f32.gmra.mrb[8].mxu1 %vm192_vm1, %v178_v42 }
  0xeb   :  { %577 = vmatprep.mubr.msk.f32.mxu1 %vm192_vm1, %v179_v41 }
  0xee   :  { %578 = vmatmul.mubr.msk.f32.gmra.mrb[10].mxu1 %vm192_vm1, %v180_v44 }
 0x1b5   :  { %v570_v49 = vpop.f32.mrb[4].mxu1 }
 0x1b6   :  { %v289_v50 = vadd.f32 %v570_v49, %v492_v48  ;;  %v283_v51 = vpop.f32.mrb[5].mxu1 }
 0x1b7   :  { %v284_v52 = vadd.f32 %v492_v48, %v283_v51 }
 0x1b8   :  { %v323_v55 = vmax.f32 %v289_v50, 0.0 }
 0x1b9   :  { %v322_v53 = vmax.f32 %v284_v52, 0.0  ;;  %v573_v54 = vpop.f32.mrb[6].mxu1 }
 0x1ba   :  { %v299_v56 = vadd.f32 %v573_v54, %v492_v48  ;;  %v293_v57 = vpop.f32.mrb[7].mxu1 }
 0x1bb   :  { %v294_v58 = vadd.f32 %v492_v48, %v293_v57  ;;  %588 = vmatprep.mubr.msk.f32.mxu0 %vm192_vm1, %v322_v53 }
 0x1bc   :  { %589 = vmatmul.mubr.msk.f32.vlgmr.msra.gmra.mrb[4].mxu0 %vm192_vm1, %v323_v55  ;;  %v325_v61 = vmax.f32 %v299_v56, 0.0 }
 0x1bd   :  { %v324_v59 = vmax.f32 %v294_v58, 0.0  ;;  %v576_v60 = vpop.f32.mrb[8].mxu1 }
 0x1be   :  { %v309_v62 = vadd.f32 %v576_v60, %v492_v48  ;;  %v303_v63 = vpop.f32.mrb[9].mxu1 }
 0x1bf   :  { %v304_v0 = vadd.f32 %v492_v48, %v303_v63  ;;  %591 = vmatprep.mubr.msk.f32.mxu0 %vm192_vm1, %v324_v59 }
 0x1c0   :  { %592 = vmatmul.mubr.msk.f32.gmra.mrb[6].mxu0 %vm192_vm1, %v325_v61  ;;  %v327_v3 = vmax.f32 %v309_v62, 0.0 }
 0x1c1   :  { %v326_v1 = vmax.f32 %v304_v0, 0.0  ;;  %v579_v2 = vpop.f32.mrb[10].mxu1 }
 0x1c2   :  { %v319_v4 = vadd.f32 %v579_v2, %v492_v48  ;;  %v313_v5 = vpop.f32.mrb[11].mxu1 }
 0x1c3   :  { %v314_v6 = vadd.f32 %v492_v48, %v313_v5  ;;  %594 = vmatprep.mubr.msk.f32.mxu0 %vm192_vm1, %v326_v1 }
 0x1c4   :  { %595 = vmatmul.mubr.msk.f32.gmra.mrb[8].mxu0 %vm192_vm1, %v327_v3  ;;  %v329_v8 = vmax.f32 %v319_v4, 0.0 }
 0x1c5   :  { %v328_v7 = vmax.f32 %v314_v6, 0.0 }
 0x1c7   :  { %597 = vmatprep.mubr.msk.f32.mxu0 %vm192_vm1, %v328_v7 }
 0x1c8   :  { %598 = vmatmul.mubr.msk.f32.gmra.mrb[10].mxu0 %vm192_vm1, %v329_v8 }
 0x28f   :  { %v590_v10 = vpop.f32.mrb[4].mxu0 }
 0x290   :  { %v437_v11 = vadd.f32 %v590_v10, %v501_v9  ;;  %v431_v12 = vpop.f32.mrb[5].mxu0 }
 0x291   :  { %v432_v13 = vadd.f32 %v501_v9, %v431_v12 }
 0x292   :  { %472 = vst.msk [vmem:[%s788_s7 + $0x8] sm:$0xff] %vm470_vm2, %v437_v11 }
 0x293   :  { %471 = vst.msk [vmem:[%s788_s7] sm:$0xff] %vm470_vm2, %v432_v13  ;;  %v593_v14 = vpop.f32.mrb[6].mxu0 }
 0x294   :  { %v447_v15 = vadd.f32 %v593_v14, %v501_v9  ;;  %v441_v16 = vpop.f32.mrb[7].mxu0 }
 0x295   :  { %v442_v17 = vadd.f32 %v501_v9, %v441_v16 }
 0x296   :  { %474 = vst.msk [vmem:[%s788_s7 + $0x18] sm:$0xff] %vm470_vm2, %v447_v15 }
 0x297   :  { %473 = vst.msk [vmem:[%s788_s7 + $0x10] sm:$0xff] %vm470_vm2, %v442_v17  ;;  %v596_v18 = vpop.f32.mrb[8].mxu0 }
 0x298   :  { %v457_v19 = vadd.f32 %v596_v18, %v501_v9  ;;  %v451_v20 = vpop.f32.mrb[9].mxu0 }
 0x299   :  { %v452_v21 = vadd.f32 %v501_v9, %v451_v20 }
 0x29a   :  { %476 = vst.msk [vmem:[%s788_s7 + $0x28] sm:$0xff] %vm470_vm2, %v457_v19 }
 0x29b   :  { %475 = vst.msk [vmem:[%s788_s7 + $0x20] sm:$0xff] %vm470_vm2, %v452_v21  ;;  %v599_v22 = vpop.f32.mrb[10].mxu0 }
 0x29c   :  { %v467_v23 = vadd.f32 %v599_v22, %v501_v9  ;;  %v461_v24 = vpop.f32.mrb[11].mxu0 }
 0x29d   :  { %v462_v25 = vadd.f32 %v501_v9, %v461_v24 }
 0x29e   :  { %478 = vst.msk [vmem:[%s788_s7 + $0x38] sm:$0xff] %vm470_vm2, %v467_v23 }
 0x29f   :  { %477 = vst.msk [vmem:[%s788_s7 + $0x30] sm:$0xff] %vm470_vm2, %v462_v25 }

</bundles_post_ra>
